<compile_context>
chip_gen: v6e
topology: v6e:2x2x1
jax: 0.10.0
libtpu: 0.0.40
codegen_flags: <defaults>
</compile_context>

<pallas_src>
import functools

import jax
import jax.numpy as jnp
from jax.experimental import pallas as pl
from jax.experimental.pallas import tpu as pltpu


def _round_up(x, m):
    return ((x + m - 1) // m) * m


# -----------------------------------------------------------------------------
# Standalone Flatten kernel (torch: x.transpose(3, 2).contiguous().view(N, -1))
# -----------------------------------------------------------------------------

def _flatten_kernel(x_ref, o_ref):
    # x_ref: (B, H, W) block of B stacked (n, c) slabs.
    # o_ref: (B, W*H) lane-dense block -> unmasked vst (W*H is the full dim and
    #        a multiple of 128 for ONet's 16x16 feature maps).
    b, h, w = x_ref.shape
    # One batched XLU transpose per block, stored straight into the flattened,
    # lane-dense output layout.
    o_ref[...] = jnp.swapaxes(x_ref[...], 1, 2).reshape(b, w * h)


# Cap the total double-buffered (input + output) footprint at 12 MiB: under
# v5e's 16 MiB scoped-VMEM default and therefore also under v6e/v7x's 32 MiB.
_FLATTEN_VMEM_BUDGET = 12 * 1024 * 1024


def _pick_block_rows(nc, h, w, itemsize, vmem_budget=_FLATTEN_VMEM_BUDGET):
    """Pick rows-per-block for the standalone flatten kernel.

    Accounts for *padded* VMEM bytes:
      input block (rows, H, W): W pads to a multiple of 128 lanes, H to a
        multiple of 8 sublanes;
      output block (rows, W*H): last dim pads to a multiple of 128, rows are
        forced to a multiple of 8 (sublane rule).
    Both are double-buffered by the BlockSpec pipeline.  Among fitting,
    divisor-of-NC, multiple-of-8 candidates we require >=2 grid steps whenever
    possible (v7x megacore: a 1-step "parallel" grid leaves one TC idle).
    """
    in_row_bytes = _round_up(h, 8) * _round_up(w, 128) * itemsize
    out_row_bytes = _round_up(w * h, 128) * itemsize
    bytes_per_row = 2 * (in_row_bytes + out_row_bytes)   # x2: double buffering
    max_rows = max(1, vmem_budget // bytes_per_row)

    cands = [d for d in range(1, nc + 1)
             if nc % d == 0 and (d % 8 == 0 or d == nc)]
    fit = [d for d in cands if d <= max_rows]
    if not fit:
        return min(cands)
    multi = [d for d in fit if nc // d >= 2]      # hard-require >=2 steps if legal
    return max(multi) if multi else max(fit)


def flatten_forward(x, *, block_rows=None):
    """Pallas equivalent of Flatten.forward for NCHW input.

    Returns (N, C*W*H), matching torch's x.transpose(3, 2).contiguous().view(N, -1).

    NOTE: this is pure layout plumbing (a full HBM round trip of the
    activation).  ONet's flatten->conv5 hot path must use
    `flatten_linear_forward` instead; keep this only where no matmul consumer
    exists.
    """
    N, C, H, W = x.shape
    NC = N * C
    x3 = x.reshape(NC, H, W)          # metadata-only collapse of (N, C)

    if block_rows is None:
        block_rows = _pick_block_rows(NC, H, W, jnp.dtype(x.dtype).itemsize)
    assert NC % block_rows == 0, (NC, block_rows)

    out = pl.pallas_call(
        _flatten_kernel,
        out_shape=jax.ShapeDtypeStruct((NC, W * H), x.dtype),
        grid_spec=pltpu.PrefetchScalarGridSpec(
            num_scalar_prefetch=0,
            grid=(NC // block_rows,),
            in_specs=[pl.BlockSpec((block_rows, H, W), lambda i: (i, 0, 0))],
            out_specs=pl.BlockSpec((block_rows, W * H), lambda i: (i, 0)),
        ),
        compiler_params=pltpu.CompilerParams(
            dimension_semantics=("parallel",),
        ),
    )(x3)

    # Final rank collapse back to (N, C*W*H) is pure metadata.
    return out.reshape(N, C * W * H)


# -----------------------------------------------------------------------------
# Fused Flatten + Linear (ONet's `flatten` -> `conv5`): the H<->W permutation is
# folded into the weight's input-dimension ordering once, offline, so the
# activation path is a single lane-dense MXU matmul with no transpose at all.
# -----------------------------------------------------------------------------

def prepare_conv5_params(weight, bias, C, H, W, *, compute_dtype=jnp.bfloat16):
    """One-time parameter prep (call at load time, NOT per forward).

    torch's conv5 weight is (O, K) with column k indexing the Flatten output's
    (c, w, h) order; reorder to the natural NCHW (c, h, w) storage order,
    transpose to (K, O), and cast to the matmul compute dtype.  The bias stays
    f32 (epilogue is f32 on every generation; v5e has no bf16 VPU).
    """
    O, K = weight.shape
    assert K == C * H * W, (K, C, H, W)
    w_perm = weight.reshape(O, C, W, H).transpose(0, 1, 3, 2).reshape(O, K)
    w_kxo = jnp.asarray(w_perm.T, dtype=compute_dtype)          # (K, O)
    b_1xo = jnp.asarray(bias, dtype=jnp.float32).reshape(1, O)  # (1, O), f32
    return w_kxo, b_1xo


def _flatten_linear_kernel(x_ref, w_ref, b_ref, o_ref):
    # x_ref: (TILE_M, K) activations in natural (c, h, w) order, compute dtype.
    # w_ref: (K, O) pre-permuted weight, resident across the grid.
    # b_ref: (1, O) f32 bias.  o_ref: (TILE_M, O) f32, lane-dense.
    acc = jnp.dot(x_ref[...], w_ref[...], preferred_element_type=jnp.float32)
    o_ref[...] = (acc + b_ref[...]).astype(o_ref.dtype)


def flatten_linear_forward(x, w_kxo, b_1xo, *, tile_m=None,
                           compute_dtype=jnp.bfloat16, out_dtype=jnp.float32):
    """y = conv5(Flatten(x)) with the Flatten transpose folded into w_kxo.

    x: (N, C, H, W) NCHW activations.  w_kxo, b_1xo: from prepare_conv5_params.
    """
    N, C, H, W = x.shape
    K, O = w_kxo.shape
    assert K == C * H * W, (K, C, H, W)

    # Free metadata reshape + dtype cast — no transpose on activations.
    g = x.reshape(N, K).astype(compute_dtype)

    # Tile the batch: 256 matches the 256-wide MXU on v6e/v7x (and is 2x128 on
    # v5e); small batches use one multiple-of-8 tile.  Pad N so every grid
    # step writes a full, unmasked lane-dense (TILE_M, O) block.
    if tile_m is None:
        tile_m = 256 if N >= 256 else _round_up(N, 8)
    assert tile_m % 8 == 0, tile_m
    n_pad = _round_up(N, tile_m)
    if n_pad != N:
        g = jnp.pad(g, ((0, n_pad - N), (0, 0)))

    out = pl.pallas_call(
        _flatten_linear_kernel,
        out_shape=jax.ShapeDtypeStruct((n_pad, O), out_dtype),
        grid_spec=pltpu.PrefetchScalarGridSpec(
            num_scalar_prefetch=0,
            grid=(n_pad // tile_m,),
            in_specs=[
                pl.BlockSpec((tile_m, K), lambda i: (i, 0)),   # pipelined over M
                pl.BlockSpec((K, O), lambda i: (0, 0)),        # weight resident
                pl.BlockSpec((1, O), lambda i: (0, 0)),        # bias resident
            ],
            out_specs=pl.BlockSpec((tile_m, O), lambda i: (i, 0)),
        ),
        compiler_params=pltpu.CompilerParams(
            dimension_semantics=("parallel",),
        ),
    )(g, w_kxo, b_1xo)

    return out[:N]


if __name__ == "__main__":
    key = jax.random.PRNGKey(0)
    k0, k1, k2, k3, k4, k5 = jax.random.split(key, 6)

    # --- standalone Flatten kernel (single-step grid, small spec shape) -------
    N, C, H, W = 2, 4, 16, 16
    x = jax.random.normal(k0, (N, C, H, W), dtype=jnp.float32)
    out = jax.block_until_ready(flatten_forward(x))
    ref = jnp.transpose(x, (0, 1, 3, 2)).reshape(N, -1)
    assert out.shape == (N, C * W * H), out.shape
    assert jnp.array_equal(out, ref), "flatten mismatch vs reference"

    # --- standalone Flatten kernel, multi-step grid (exercises block picking) -
    xm = jax.random.normal(k4, (2, 64, 16, 16), dtype=jnp.float32)
    outm = jax.block_until_ready(flatten_forward(xm))
    refm = jnp.transpose(xm, (0, 1, 3, 2)).reshape(2, -1)
    assert jnp.array_equal(outm, refm), "multi-step flatten mismatch"

    # --- fused Flatten + conv5 Linear(1152, 256), ONet's real hot path --------
    Nf, Cf, Hf, Wf, O = 2, 128, 3, 3, 256
    xf = jax.random.normal(k1, (Nf, Cf, Hf, Wf), dtype=jnp.float32)
    wf = jax.random.normal(k2, (O, Cf * Hf * Wf), dtype=jnp.float32) * 0.02
    bf = jax.random.normal(k3, (O,), dtype=jnp.float32)

    # One-time parameter prep (hoisted out of the per-call path).
    w_kxo, b_1xo = prepare_conv5_params(wf, bf, Cf, Hf, Wf,
                                        compute_dtype=jnp.bfloat16)

    yf = jax.block_until_ready(flatten_linear_forward(xf, w_kxo, b_1xo))
    assert yf.shape == (Nf, O), yf.shape

    # Primary (tight) check: baseline built from the identical bf16 inputs,
    # f32 accumulation — only the reduction order differs from the kernel.
    flat_ref = jnp.transpose(xf, (0, 1, 3, 2)).reshape(Nf, -1)     # torch order
    ref_bf16 = jnp.dot(flat_ref.astype(jnp.bfloat16),
                       wf.T.astype(jnp.bfloat16),
                       preferred_element_type=jnp.float32) + bf
    assert jnp.allclose(yf, ref_bf16, rtol=5e-4, atol=5e-4), float(
        jnp.max(jnp.abs(yf - ref_bf16)))

    # Secondary check: bf16 quantization headroom vs the pure-f32 torch math.
    ref_f32 = flat_ref @ wf.T + bf
    assert jnp.allclose(yf, ref_f32, rtol=0, atol=3e-2), float(
        jnp.max(jnp.abs(yf - ref_f32)))

    # --- fused path with a bigger (non-multiple) batch: pad + multi-step grid -
    Nb = 40
    xb = jax.random.normal(k5, (Nb, Cf, Hf, Wf), dtype=jnp.float32)
    fwd = jax.jit(functools.partial(flatten_linear_forward, tile_m=16))
    yb = jax.block_until_ready(fwd(xb, w_kxo, b_1xo))
    assert yb.shape == (Nb, O), yb.shape
    flat_b = jnp.transpose(xb, (0, 1, 3, 2)).reshape(Nb, -1)
    ref_b = jnp.dot(flat_b.astype(jnp.bfloat16),
                    wf.T.astype(jnp.bfloat16),
                    preferred_element_type=jnp.float32) + bf
    assert jnp.allclose(yb, ref_b, rtol=5e-4, atol=5e-4), float(
        jnp.max(jnp.abs(yb - ref_b)))

    print("KERNEL_OK")
</pallas_src>

<mosaic_0001>
module attributes {stable_mosaic.version = 11 : i64} {
  func.func @_flatten_kernel(%arg0: i32, %arg1: memref<8x16x16xf32, #tpu.memory_space<vmem>>, %arg2: memref<8x256xf32, #tpu.memory_space<vmem>>) attributes {dimension_semantics = [#tpu.dimension_semantics<parallel>], iteration_bounds = array<i64: 1>, scalar_prefetch = 0 : i64, scratch_operands = 0 : i64, tpu.core_type = #tpu.core_type<tc>, window_params = [{transform_indices = @transform_0, window_bounds = array<i64: 8, 16, 16>}, {transform_indices = @transform_1, window_bounds = array<i64: 8, 256>}]} {
    %c0 = arith.constant 0 : index
    %c0_0 = arith.constant 0 : index
    %c0_1 = arith.constant 0 : index
    %0 = vector.load %arg1[%c0, %c0_0, %c0_1] : memref<8x16x16xf32, #tpu.memory_space<vmem>>, vector<8x16x16xf32>
    %1 = tpu.transpose %0, [0, 2, 1] : vector<8x16x16xf32> -> vector<8x16x16xf32>
    %2 = vector.shape_cast %1 : vector<8x16x16xf32> to vector<8x256xf32>
    %c0_2 = arith.constant 0 : index
    %c0_3 = arith.constant 0 : index
    %3 = vector.load %arg2[%c0_2, %c0_3] : memref<8x256xf32, #tpu.memory_space<vmem>>, vector<8x256xf32>
    tpu.vector_store %arg2[%c0_2, %c0_3], %2 {strides = array<i32>} : memref<8x256xf32, #tpu.memory_space<vmem>>, vector<8x256xf32>,
    return
  }
  func.func @transform_0(%arg0: i32) -> (i32, i32, i32) {
    %c0_i32 = arith.constant 0 : i32
    %c0_i32_0 = arith.constant 0 : i32
    %c0_i32_1 = arith.constant 0 : i32
    return %arg0, %c0_i32, %c0_i32_0 : i32, i32, i32
  }
  func.func @transform_1(%arg0: i32) -> (i32, i32) {
    %c0_i32 = arith.constant 0 : i32
    %c0_i32_0 = arith.constant 0 : i32
    return %arg0, %c0_i32 : i32, i32
  }
}

</mosaic_0001>

<bundles_post_ra>
// kernel: tpu_custom_call.1
= control target key start
LH: loop header
LB: loop body
LE: loop exit
PB: predicated region body
PF: predicated region fallthrough
CT: control target
= control target key end

     0   :  { %6 = vsyncpa [#allocation3], 0  ;;  %s802_s0 = inlined_call_operand.hbm [shape: f32[8,16,16], index: 0, kind: input, shape index: {}]   ;;  %s803_s1 = inlined_call_operand.hbm [shape: f32[8,256], index: 1, kind: output, shape index: {}]  }
   0x1   :  { %7 = vsyncpa [#allocation4], 0  ;;  %s719_s6 = smov [#allocation2]  }
   0x2   :  { %s13_s7 = sshll.u32 %s719_s6, 4  ;;  %s14_s7 = int_to_ptr.vmem [resolvable:$true] %s13_s7 }
   0x3   :  { %s683_s8 = scalar_lea.vmem %s14_s7, 2048  ;;  %p688_p1 = scmp.lt.s32.totalorder %s14_s7, %s14_s7 }
   0x4   :  { %p684_p0 = scmp.ne.s32.totalorder %s14_s7, %s683_s8  ;;  %p689_p2 = scmp.lt.s32.totalorder %s683_s8, %s683_s8 }
   0x6   :  { %p690_p3 = por %p689_p2, %p688_p1 }
   0x8   :  { %p691_p4 = pnand %p690_p3, %p684_p0 }
   0xa   :  { %694 = shalt.err (!%p691_p4)
}
   0xb   :  { %s720_s9 = smov 128   ;;  %s721_s10 = smov 8  }
   0xc   :  { %19 = dma.hbm_to_vmem [thread:$0]  %s802_s0, 2048, %s14_s7, [#allocation3], %s720_s9, %s720_s9, %s721_s10  }
   0xd   :  { %715 = dma.done.wait [#allocation3], 2048  }
   0xe   :  { %716 = vsyncadd [#allocation3], 4294965248  ;;  %v25_v0 = vld [vmem:[#allocation2 + $0x10] sm:$0xff]  ;;  %v23_v1 = vld [vmem:[#allocation2] sm:$0xff]  ;;  %v722_v20 = vmov 1983009808   ;;  %v300_v22 = vlaneseq }
   0xf   :  { %71 = vxpose.xlu1.b32.start [1/2] (short) (narrow) %v25_v0, 16  ;;  %39 = vxpose.xlu0.b32.start [1/2] (short) (narrow) %v23_v1, 16  ;;  %v26_v2 = vld [vmem:[#allocation2 + $0x18] sm:$0xff]  ;;  %v24_v3 = vld [vmem:[#allocation2 + $0x8] sm:$0xff]  ;;  %v29_v4 = vld [vmem:[#allocation2 + $0x30] sm:$0xff]  ;;  %v298_v21 = vunpack.c.l.s4 %v722_v20  ;;  %s724_s0 = smov 32  }
  0x10   :  { %v27_v5 = vld [vmem:[#allocation2 + $0x20] sm:$0xff]  ;;  %v30_v6 = vld [vmem:[#allocation2 + $0x38] sm:$0xff]  ;;  %v28_v7 = vld [vmem:[#allocation2 + $0x28] sm:$0xff]  ;;  %v301_v26 = vshrl.u32 %v300_v22, 7  ;;  %v723_v29 = vmov 1934713408  }
  0x11   :  { %v33_v8 = vld [vmem:[#allocation2 + $0x50] sm:$0xff]  ;;  %v31_v9 = vld [vmem:[#allocation2 + $0x40] sm:$0xff]  ;;  %v34_v10 = vld [vmem:[#allocation2 + $0x58] sm:$0xff]  ;;  %v299_v25 = vunpack.c.0.s8 %v298_v21  ;;  %v362_v30 = vunpack.c.l.s4 %v723_v29  ;;  %s725_s13 = smov 16   ;;  %s726_s14 = smov 48   ;;  %vm623_vm0 = vcmask 130048  }
  0x12   :  { %v32_v11 = vld [vmem:[#allocation2 + $0x48] sm:$0xff]  ;;  %v37_v12 = vld [vmem:[#allocation2 + $0x70] sm:$0xff]  ;;  %v35_v13 = vld [vmem:[#allocation2 + $0x60] sm:$0xff]  ;;  %s727_s15 = smov 64   ;;  %s728_s16 = smov 80   ;;  %vm625_vm1 = vcmask 261120  }
  0x13   :  { %72 = vxpose.xlu1.b32.end [2/2] (short) (narrow) %v26_v2, 16  ;;  %40 = vxpose.xlu0.b32.end [2/2] (short) (narrow) %v24_v3, 16  ;;  %v38_v14 = vld [vmem:[#allocation2 + $0x78] sm:$0xff]  ;;  %v36_v15 = vld [vmem:[#allocation2 + $0x68] sm:$0xff]  ;;  %v302_v31 = vsub.s32 %v299_v25, %v301_v26  ;;  %v363_v36 = vunpack.c.0.s8 %v362_v30  ;;  %s729_s17 = smov 96   ;;  %s730_s18 = smov 112  }
  0x14   :  { %vm627_vm2 = vcmask 392192   ;;  %vm629_vm3 = vcmask 523264   ;;  %vm633_vm4 = vcmask 785408   ;;  %vm631_vm5 = vcmask 654336   ;;  %s731_s19 = smov [#allocation5]  }
  0x15   :  { %v745_v44 = vsub.s32 %v363_v36, %v301_v26  ;;  %vm635_vm6 = vcmask 916480   ;;  %s652_s20 = sshll.u32 %s731_s19, 4  ;;  %s653_s20 = int_to_ptr.vmem [resolvable:$true] %s652_s20 }
  0x16   :  { %s695_s21 = scalar_lea.vmem %s653_s20, 256  ;;  %p700_p6 = scmp.lt.s32.totalorder %s653_s20, %s653_s20 }
  0x17   :  { %135 = vxpose.xlu1.b32.start [1/2] (short) (narrow) %v29_v4, 16  ;;  %103 = vxpose.xlu0.b32.start [1/2] (short) (narrow) %v27_v5, 16  ;;  %p696_p5 = scmp.ne.s32.totalorder %s653_s20, %s695_s21  ;;  %p701_p7 = scmp.lt.s32.totalorder %s695_s21, %s695_s21 }
  0x19   :  { %p702_p8 = por %p701_p7, %p700_p6 }
  0x1b   :  { %136 = vxpose.xlu1.b32.end [2/2] (short) (narrow) %v30_v6, 16  ;;  %104 = vxpose.xlu0.b32.end [2/2] (short) (narrow) %v28_v7, 16  ;;  %p703_p9 = pnand %p702_p8, %p696_p5 }
  0x1f   :  { %199 = vxpose.xlu1.b32.start [1/2] (short) (narrow) %v33_v8, 16  ;;  %167 = vxpose.xlu0.b32.start [1/2] (short) (narrow) %v31_v9, 16 }
  0x23   :  { %200 = vxpose.xlu1.b32.end [2/2] (short) (narrow) %v34_v10, 16  ;;  %168 = vxpose.xlu0.b32.end [2/2] (short) (narrow) %v32_v11, 16 }
  0x27   :  { %263 = vxpose.xlu1.b32.start [1/2] (short) (narrow) %v37_v12, 16  ;;  %231 = vxpose.xlu0.b32.start [1/2] (short) (narrow) %v35_v13, 16 }
  0x2b   :  { %264 = vxpose.xlu1.b32.end [2/2] (short) (narrow) %v38_v14, 16  ;;  %232 = vxpose.xlu0.b32.end [2/2] (short) (narrow) %v36_v15, 16 }
  0x8b   :  { %v87_v16 = vpop.trf.xlu1  ;;  %v55_v17 = vpop.trf.xlu0 }
  0x8f   :  { %v88_v18 = vpop.trf.xlu1  ;;  %v56_v19 = vpop.trf.xlu0 }
  0x93   :  { %v151_v23 = vpop.trf.xlu1  ;;  %v119_v24 = vpop.trf.xlu0 }
  0x94   :  { %v311_v32 = vcombine.low %v87_v16, %v151_v23  ;;  %v295_v33 = vcombine.low %v55_v17, %v119_v24  ;;  %v312_v41 = vcombine.high %v87_v16, %v151_v23  ;;  %v296_v45 = vcombine.high %v55_v17, %v119_v24 }
  0x96   :  { %v319_v37 = vrot.slane %v311_v32, %v302_v31  ;;  %v303_v38 = vrot.slane %v295_v33, %v302_v31  ;;  %v747_v55 = vrot.slane %v312_v41, %v302_v31  ;;  %v749_v61 = vrot.slane %v296_v45, %v302_v31 }
  0x97   :  { %v152_v27 = vpop.trf.xlu1  ;;  %v120_v28 = vpop.trf.xlu0 }
  0x98   :  { %v447_v42 = vcombine.low %v88_v18, %v152_v27  ;;  %v431_v43 = vcombine.low %v56_v19, %v120_v28  ;;  %v359_v46 = vcombine.low %v303_v38, %v319_v37  ;;  %v360_v47 = vcombine.high %v303_v38, %v319_v37 }
  0x99   :  { %v448_v48 = vcombine.high %v88_v18, %v152_v27  ;;  %v432_v56 = vcombine.high %v56_v19, %v120_v28  ;;  %v375_v26 = vcombine.low %v749_v61, %v747_v55 }
  0x9a   :  { %v455_v57 = vrot.slane %v447_v42, %v302_v31  ;;  %v439_v58 = vrot.slane %v431_v43, %v302_v31  ;;  %v374_v1 = vrot.slane %v360_v47, %v745_v44  ;;  %v755_v2 = vrot.slane %v359_v46, %v745_v44 }
  0x9b   :  { %v215_v34 = vpop.trf.xlu1  ;;  %v183_v35 = vpop.trf.xlu0  ;;  %v751_v62 = vrot.slane %v448_v48, %v302_v31  ;;  %v446_v11 = vrot.slane %v432_v56, %v302_v31  ;;  %v383_v37 = vrot.slane %v375_v26, %v745_v44 }
  0x9c   :  { %v496_v12 = vcombine.high %v439_v58, %v455_v57  ;;  %v495_v19 = vcombine.low %v439_v58, %v455_v57 }
  0x9d   :  { %v511_v27 = vcombine.low %v446_v11, %v751_v62  ;;  %v512_v43 = vcombine.high %v446_v11, %v751_v62 }
  0x9e   :  { %v510_v28 = vrot.slane %v496_v12, %v745_v44  ;;  %v503_v33 = vrot.slane %v495_v19, %v745_v44 }
  0x9f   :  { %v216_v39 = vpop.trf.xlu1  ;;  %v184_v40 = vpop.trf.xlu0  ;;  %v526_v48 = vrot.slane %v512_v43, %v745_v44 }
  0xa3   :  { %v279_v49 = vpop.trf.xlu1  ;;  %v247_v50 = vpop.trf.xlu0 }
  0xa4   :  { %v343_v51 = vcombine.low %v215_v34, %v279_v49  ;;  %v344_v52 = vcombine.high %v215_v34, %v279_v49  ;;  %v327_v53 = vcombine.low %v183_v35, %v247_v50  ;;  %v328_v54 = vcombine.high %v183_v35, %v247_v50 }
  0xa6   :  { %v351_v59 = vrot.slane %v343_v51, %v302_v31  ;;  %v335_v60 = vrot.slane %v327_v53, %v302_v31  ;;  %v757_v3 = vrot.slane %v344_v52, %v302_v31  ;;  %v759_v4 = vrot.slane %v328_v54, %v302_v31 }
  0xa7   :  { %v280_v63 = vpop.trf.xlu1  ;;  %v248_v0 = vpop.trf.xlu0  ;;  %v376_v52 = vcombine.high %v749_v61, %v747_v55 }
  0xa8   :  { %v391_v5 = vcombine.low %v335_v60, %v351_v59  ;;  %v392_v6 = vcombine.high %v335_v60, %v351_v59  ;;  %v479_v7 = vcombine.low %v216_v39, %v280_v63  ;;  %v480_v8 = vcombine.high %v216_v39, %v280_v63 }
  0xa9   :  { %v463_v9 = vcombine.low %v184_v40, %v248_v0  ;;  %v464_v10 = vcombine.high %v184_v40, %v248_v0  ;;  %v407_v20 = vcombine.low %v759_v4, %v757_v3  ;;  %v519_v39 = vrot.slane %v511_v27, %v745_v44 }
  0xaa   :  { %v406_v13 = vrot.slane %v392_v6, %v745_v44  ;;  %v763_v14 = vrot.slane %v391_v5, %v745_v44  ;;  %v487_v15 = vrot.slane %v479_v7, %v302_v31  ;;  %v494_v16 = vrot.slane %v480_v8, %v302_v31 }
  0xab   :  { %v471_v17 = vrot.slane %v463_v9, %v302_v31  ;;  %v478_v18 = vrot.slane %v464_v10, %v302_v31  ;;  %v415_v32 = vrot.slane %v407_v20, %v745_v44  ;;  %v408_v49 = vcombine.high %v759_v4, %v757_v3 }
  0xac   :  { %v425_v21 = vcombine.low %v374_v1, %v406_v13  ;;  %v424_v22 = vcombine.high %v755_v2, %v763_v14  ;;  %v426_v31 = vcombine.high %v374_v1, %v406_v13  ;;  %v423_v34 = vcombine.low %v755_v2, %v763_v14 }
  0xad   :  { %v527_v23 = vcombine.low %v471_v17, %v487_v15  ;;  %v528_v24 = vcombine.high %v471_v17, %v487_v15  ;;  %v543_v25 = vcombine.low %v478_v18, %v494_v16  ;;  %v427_v40 = vcombine.low %v383_v37, %v415_v32 }
  0xae   :  { %572 = vrot.lane.b32.xlu1 %v425_v21, %s724_s0  ;;  %568 = vrot.lane.b32.xlu0 %v424_v22, %s725_s13  ;;  %v544_v41 = vcombine.high %v478_v18, %v494_v16  ;;  %v428_v45 = vcombine.high %v383_v37, %v415_v32  ;;  %v422_v54 = vrot.slane %v408_v49, %v745_v44 }
  0xaf   :  { %v542_v29 = vrot.slane %v528_v24, %v745_v44  ;;  %v535_v30 = vrot.slane %v527_v23, %v745_v44  ;;  %v551_v36 = vrot.slane %v543_v25, %v745_v44  ;;  %v390_v57 = vrot.slane %v376_v52, %v745_v44 }
  0xb0   :  { %v558_v47 = vrot.slane %v544_v41, %v745_v44 }
  0xb1   :  { %v562_v35 = vcombine.high %v510_v28, %v542_v29  ;;  %v559_v38 = vcombine.low %v503_v33, %v535_v30  ;;  %v563_v42 = vcombine.low %v519_v39, %v551_v36  ;;  %v564_v46 = vcombine.high %v519_v39, %v551_v36 }
  0xb2   :  { %576 = vrot.lane.b32.xlu1 %v426_v31, %s726_s14  ;;  %v560_v50 = vcombine.high %v503_v33, %v535_v30  ;;  %v565_v51 = vcombine.low %v526_v48, %v558_v47  ;;  %v561_v53 = vcombine.low %v510_v28, %v542_v29  ;;  %v566_v56 = vcombine.high %v526_v48, %v558_v47 }
  0xb3   :  { %604 = vrot.lane.b32.xlu0 %v562_v35, %s726_s14  ;;  %v429_v58 = vcombine.low %v390_v57, %v422_v54  ;;  %v430_v59 = vcombine.high %v390_v57, %v422_v54 }
  0xb6   :  { %580 = vrot.lane.b32.xlu1 %v427_v40, %s727_s15 }
  0xb7   :  { %608 = vrot.lane.b32.xlu0 %v563_v42, %s727_s15 }
  0xba   :  { %584 = vrot.lane.b32.xlu1 %v428_v45, %s728_s16 }
  0xbb   :  { %612 = vrot.lane.b32.xlu0 %v564_v46, %s728_s16 }
  0xbe   :  { %596 = vrot.lane.b32.xlu1 %v560_v50, %s725_s13 }
  0xbf   :  { %616 = vrot.lane.b32.xlu0 %v565_v51, %s729_s17 }
  0xc2   :  { %600 = vrot.lane.b32.xlu1 %v561_v53, %s724_s0 }
  0xc3   :  { %620 = vrot.lane.b32.xlu0 %v566_v56, %s730_s18 }
  0xc6   :  { %588 = vrot.lane.b32.xlu1 %v429_v58, %s729_s17 }
  0xca   :  { %592 = vrot.lane.b32.xlu1 %v430_v59, %s730_s18 }
 0x120   :  { %v573_v60 = vpop.permute.xlu1 %572  ;;  %v569_v55 = vpop.permute.xlu0 %568 }
 0x121   :  { %v624_v6 = vsel %vm623_vm0, %v423_v34, %v569_v55 }
 0x122   :  { %v626_v10 = vsel %vm625_vm1, %v624_v6, %v573_v60 }
 0x124   :  { %v577_v61 = vpop.permute.xlu1 %576 }
 0x125   :  { %v605_v62 = vpop.permute.xlu0 %604  ;;  %v628_v13 = vsel %vm627_vm2, %v626_v10, %v577_v61 }
 0x128   :  { %v581_v63 = vpop.permute.xlu1 %580 }
 0x129   :  { %v609_v0 = vpop.permute.xlu0 %608  ;;  %v630_v16 = vsel %vm629_vm3, %v628_v13, %v581_v63 }
 0x12c   :  { %v585_v1 = vpop.permute.xlu1 %584 }
 0x12d   :  { %v613_v2 = vpop.permute.xlu0 %612  ;;  %v632_v18 = vsel %vm631_vm5, %v630_v16, %v585_v1 }
 0x130   :  { %v597_v3 = vpop.permute.xlu1 %596 }
 0x131   :  { %v617_v4 = vpop.permute.xlu0 %616  ;;  %v637_v5 = vsel %vm623_vm0, %v559_v38, %v597_v3 }
 0x134   :  { %v601_v44 = vpop.permute.xlu1 %600 }
 0x135   :  { %v638_v7 = vsel %vm625_vm1, %v637_v5, %v601_v44  ;;  %v621_v15 = vpop.permute.xlu0 %620 }
 0x136   :  { %v639_v8 = vsel %vm627_vm2, %v638_v7, %v605_v62 }
 0x137   :  { %v640_v9 = vsel %vm629_vm3, %v639_v8, %v609_v0 }
 0x138   :  { %v641_v11 = vsel %vm631_vm5, %v640_v9, %v613_v2  ;;  %v589_v12 = vpop.permute.xlu1 %588 }
 0x139   :  { %v642_v14 = vsel %vm633_vm4, %v641_v11, %v617_v4  ;;  %v634_v19 = vsel %vm633_vm4, %v632_v18, %v589_v12 }
 0x13a   :  { %v643_v17 = vsel %vm635_vm6, %v642_v14, %v621_v15 }
 0x13b   :  { %645 = vst [vmem:[#allocation5 + $0x8] sm:$0xff] %v643_v17 }
 0x13c   :  { %v593_v20 = vpop.permute.xlu1 %592 }
 0x13d   :  { %v636_v21 = vsel %vm635_vm6, %v634_v19, %v593_v20 }
 0x13e   :  { %644 = vst [vmem:[#allocation5] sm:$0xff] %v636_v21 }
 0x13f   :  { %706 = shalt.err (!%p703_p9)
}
 0x140   :  { %655 = dma.vmem_to_hbm [thread:$0]  %s653_s20, 256, %s803_s1, [#allocation4]  }
 0x141   :  { %717 = dma.done.wait [#allocation4], 256  }
 0x142   :  { %718 = vsyncadd [#allocation4], 4294967040 }
 0x143   :  { %659 = vsyncpa [#allocation3], 1 }
 0x144   :  { %660 = vsyncpa [#allocation4], 1 }

</bundles_post_ra>
